<compile_context>
chip_gen: v5e
topology: v5e:2x2
jax: 0.10.0
libtpu: 0.0.40
codegen_flags: <defaults>
</compile_context>

<pallas_src>
import functools

import jax
import jax.numpy as jnp
from jax import lax
from jax.experimental import pallas as pl
from jax.experimental.pallas import tpu as pltpu

EPS = 1e-8
_VMEM_LIMIT = 32 * 1024 * 1024      # scoped-VMEM request, safe on v5e/v6e/v7x


def _round_up(x, m):
    return ((x + m - 1) // m) * m


def _tensorcores_per_chip():
    """2 on chips whose grid axes shard across TensorCores (v7x, v4), else 1."""
    try:
        kind = jax.devices()[0].device_kind.lower()
    except Exception:
        return 1
    if "7" in kind or "v4" in kind:
        return 2
    return 1


def _pick_tile(extent, unit, cap, n_tc):
    """Tile size along the single blocked grid axis.

    extent: logical axis size; unit: HW granule (8 sublanes / 128 lanes);
    cap: largest tile (a multiple of `unit`) allowed by the VMEM budget.
    1-TC chips: one full-size block when it fits (never manufacture grid steps).
    2-TC chips: aim for >=4 balanced parallel steps before shrinking tiles.
    """
    if n_tc > 1 and extent >= 4 * unit:
        tile = min(cap, _round_up(-(-extent // 4), unit))
        return tile if tile < extent else extent
    return extent if extent <= cap else cap


# ---------------------------------------------------------------------------
# Kernels
# ---------------------------------------------------------------------------

def _coords_norm_interleaved_kernel(scale_ref, x_ref, o_ref):
    """x_ref/o_ref: (tile_r, C) blocks of the flat coords buffer, C = 3*128.

    Each row holds whole (x, y, z) triplets, so the per-point L2 norm is a
    3-lane window sum built from XLU lane rolls (dense sublane AND lane use).
    """
    x = x_ref[...].astype(jnp.float32)                     # (tr, C)
    c = x.shape[-1]                                        # static, multiple of 384
    xx = x * x
    # Symmetric 3-wide window sum: correct at the centre (y) lane of every triplet,
    # independent of roll sign convention and of row-edge wraparound (rows start
    # and end on point boundaries because C % 3 == 0).
    s = xx + pltpu.roll(xx, 1, axis=1) + pltpu.roll(xx, c - 1, axis=1)
    # 1 / max(norm, eps) == rsqrt(max(|p|^2, eps^2)); fold the learned scale in (EUP).
    inv = lax.rsqrt(jnp.maximum(s, EPS * EPS)) * scale_ref[0]
    # Keep inv only on centre lanes, then spread it to both neighbouring lanes.
    lane = lax.broadcasted_iota(jnp.int32, (1, c), 1)
    inv_c = jnp.where(lane % 3 == 1, inv, 0.0)             # (tr, C)
    inv_all = inv_c + pltpu.roll(inv_c, 1, axis=1) + pltpu.roll(inv_c, c - 1, axis=1)
    o_ref[...] = (x * inv_all).astype(o_ref.dtype)         # dense store


def _coords_norm_transposed_kernel(scale_ref, x_ref, o_ref):
    """x_ref/o_ref: (D, tile_n) blocks, points on the lane axis (D is tiny)."""
    x = x_ref[...].astype(jnp.float32)                     # (D, tn)
    xx = x * x                                             # square once on the full tile
    sq = xx[0:1, :]
    for i in range(1, x.shape[0]):                         # D-term VPU sum over sublanes
        sq = sq + xx[i:i + 1, :]
    inv = lax.rsqrt(jnp.maximum(sq, EPS * EPS)) * scale_ref[0]   # (1, tn)
    o_ref[...] = (x * inv).astype(o_ref.dtype)             # sublane broadcast, dense store


# ---------------------------------------------------------------------------
# pallas_call wrappers
# ---------------------------------------------------------------------------

def _run_interleaved(x2d, scale, out_dtype, n_tc, row_cap):
    R, C = x2d.shape
    tr = _pick_tile(R, 8, row_cap, n_tc)
    return pl.pallas_call(
        _coords_norm_interleaved_kernel,
        out_shape=jax.ShapeDtypeStruct((R, C), out_dtype),
        grid_spec=pltpu.PrefetchScalarGridSpec(
            num_scalar_prefetch=0,
            grid=(pl.cdiv(R, tr),),
            in_specs=[
                pl.BlockSpec(memory_space=pltpu.MemorySpace.SMEM),   # scale (scalar)
                pl.BlockSpec((tr, C), lambda i: (i, 0)),             # coords rows
            ],
            out_specs=pl.BlockSpec((tr, C), lambda i: (i, 0)),
        ),
        input_output_aliases={1: 0},                                 # donate coords buffer
        compiler_params=pltpu.CompilerParams(
            dimension_semantics=("parallel",),
            vmem_limit_bytes=_VMEM_LIMIT,
        ),
    )(scale, x2d)


def _run_transposed(x_t, scale, out_dtype, n_tc, lane_cap):
    D, M = x_t.shape
    tn = _pick_tile(M, 128, lane_cap, n_tc)
    return pl.pallas_call(
        _coords_norm_transposed_kernel,
        out_shape=jax.ShapeDtypeStruct((D, M), out_dtype),
        grid_spec=pltpu.PrefetchScalarGridSpec(
            num_scalar_prefetch=0,
            grid=(pl.cdiv(M, tn),),
            in_specs=[
                pl.BlockSpec(memory_space=pltpu.MemorySpace.SMEM),   # scale (scalar)
                pl.BlockSpec((D, tn), lambda i: (0, i)),             # lane-dense tile
            ],
            out_specs=pl.BlockSpec((D, tn), lambda i: (0, i)),
        ),
        input_output_aliases={1: 0},
        compiler_params=pltpu.CompilerParams(
            dimension_semantics=("parallel",),
            vmem_limit_bytes=_VMEM_LIMIT,
        ),
    )(scale, x_t)


@functools.partial(jax.jit, static_argnames=("lane_tile", "row_tile"))
def coords_norm(coords, scale, *, lane_tile=131072, row_tile=2048):
    """CoordsNorm forward: coords (..., D), scale (1,) -> (..., D)."""
    orig_shape = coords.shape
    D = orig_shape[-1]
    M = 1
    for s in orig_shape[:-1]:
        M *= s
    scale = scale.reshape((1,)).astype(jnp.float32)
    n_tc = _tensorcores_per_chip()

    if D == 3 and M > 0 and M % 128 == 0:
        # Fast path: flat (M // 128, 384) view -- 128 whole xyz triplets per row,
        # zero relayout passes, fully dense vreg occupancy.
        x2d = coords.reshape(M // 128, 384)
        out = _run_interleaved(x2d, scale, coords.dtype, n_tc, row_tile)
        return out.reshape(orig_shape)

    # Fallback (any M / D): lane-dense transposed layout.  The two relayouts cost
    # extra HBM passes but keep the kernel itself dense for awkward point counts.
    x_t = coords.reshape(M, D).T
    out_t = _run_transposed(x_t, scale, coords.dtype, n_tc, lane_tile)
    return out_t.T.reshape(orig_shape)


if __name__ == "__main__":
    key = jax.random.PRNGKey(0)
    k1, k2 = jax.random.split(key)

    # Parameter init mirroring the module: scale = torch.zeros(1).fill_(scale_init=1.0)
    scale = jnp.full((1,), 1.0, dtype=jnp.float32)

    def ref_fn(c, s):
        norm = jnp.linalg.norm(c, axis=-1, keepdims=True)
        return c / jnp.maximum(norm, EPS) * s[0]

    # Small generic shape (batch=2, nodes=8, spatial=3) -> exercises the fallback path.
    coords_a = jax.random.normal(k1, (2, 8, 3), dtype=jnp.float32)
    out_a = jax.block_until_ready(coords_norm(coords_a, scale))
    assert out_a.shape == coords_a.shape
    assert jnp.allclose(out_a, ref_fn(coords_a, scale), atol=1e-5, rtol=1e-5), \
        "fallback path mismatch vs reference"

    # Point count divisible by 128 (batch=4, nodes=128, spatial=3) -> interleaved fast path.
    coords_b = jax.random.normal(k2, (4, 128, 3), dtype=jnp.float32)
    out_b = jax.block_until_ready(coords_norm(coords_b, scale))
    assert out_b.shape == coords_b.shape
    assert jnp.allclose(out_b, ref_fn(coords_b, scale), atol=1e-5, rtol=1e-5), \
        "interleaved fast path mismatch vs reference"

    print("KERNEL_OK")
</pallas_src>

<mosaic_0001>
module attributes {stable_mosaic.version = 11 : i64} {
  func.func @_coords_norm_transposed_kernel(%arg0: i32, %arg1: memref<1xf32, #tpu.memory_space<smem>>, %arg2: memref<3x16xf32, #tpu.memory_space<vmem>>, %arg3: memref<3x16xf32, #tpu.memory_space<vmem>>) attributes {dimension_semantics = [#tpu.dimension_semantics<parallel>], iteration_bounds = array<i64: 1>, scalar_prefetch = 0 : i64, scratch_operands = 0 : i64, tpu.core_type = #tpu.core_type<tc>, window_params = [{transform_indices = @transform_0, window_bounds = array<i64: 1>}, {transform_indices = @transform_1, window_bounds = array<i64: 3, 16>}, {transform_indices = @transform_2, window_bounds = array<i64: 3, 16>}]} {
    %c0 = arith.constant 0 : index
    %c0_0 = arith.constant 0 : index
    %0 = vector.load %arg2[%c0, %c0_0] : memref<3x16xf32, #tpu.memory_space<vmem>>, vector<3x16xf32>
    %1 = arith.mulf %0, %0 : vector<3x16xf32>
    %2 = vector.extract_strided_slice %1 {offsets = [0, 0], sizes = [1, 16], strides = [1, 1]} : vector<3x16xf32> to vector<1x16xf32>
    %3 = vector.extract_strided_slice %1 {offsets = [1, 0], sizes = [1, 16], strides = [1, 1]} : vector<3x16xf32> to vector<1x16xf32>
    %4 = arith.addf %2, %3 : vector<1x16xf32>
    %5 = vector.extract_strided_slice %1 {offsets = [2, 0], sizes = [1, 16], strides = [1, 1]} : vector<3x16xf32> to vector<1x16xf32>
    %6 = arith.addf %4, %5 : vector<1x16xf32>
    %cst = arith.constant 1.000000e-16 : f32
    %7 = vector.broadcast %cst : f32 to vector<1x16xf32>
    %8 = arith.maximumf %6, %7 : vector<1x16xf32>
    %9 = math.rsqrt %8 : vector<1x16xf32>
    %c0_1 = arith.constant 0 : index
    %10 = memref.load %arg1[%c0_1] : memref<1xf32, #tpu.memory_space<smem>>
    %11 = vector.broadcast %10 : f32 to vector<1x16xf32>
    %12 = arith.mulf %9, %11 : vector<1x16xf32>
    %13 = vector.broadcast %12 : vector<1x16xf32> to vector<3x16xf32>
    %14 = arith.mulf %0, %13 : vector<3x16xf32>
    %c0_2 = arith.constant 0 : index
    %c0_3 = arith.constant 0 : index
    %15 = vector.load %arg3[%c0_2, %c0_3] : memref<3x16xf32, #tpu.memory_space<vmem>>, vector<3x16xf32>
    tpu.vector_store %arg3[%c0_2, %c0_3], %14 {strides = array<i32>} : memref<3x16xf32, #tpu.memory_space<vmem>>, vector<3x16xf32>,
    return
  }
  func.func @transform_0(%arg0: i32) -> i32 {
    %c0_i32 = arith.constant 0 : i32
    %c0_i32_0 = arith.constant 0 : i32
    return %c0_i32 : i32
  }
  func.func @transform_1(%arg0: i32) -> (i32, i32) {
    %c0_i32 = arith.constant 0 : i32
    %c0_i32_0 = arith.constant 0 : i32
    return %c0_i32, %arg0 : i32, i32
  }
  func.func @transform_2(%arg0: i32) -> (i32, i32) {
    %c0_i32 = arith.constant 0 : i32
    %c0_i32_0 = arith.constant 0 : i32
    return %c0_i32, %arg0 : i32, i32
  }
}

</mosaic_0001>

<bundles_post_ra>
// kernel: coords_norm.1
= control target key start
LH: loop header
LB: loop body
LE: loop exit
PB: predicated region body
PF: predicated region fallthrough
CT: control target
= control target key end

     0   :  { %vm37_vm3 = vcmask 124928   ;;  %s69_s1 = inlined_call_operand.vmem [shape: f32[3,16], index: 1, kind: input, shape index: {}, may-alias: {1,2}]   ;;  %s70_s0 = inlined_call_operand.<no memory space> [shape: f32[1], index: 0, kind: input, shape index: {}]   ;;  %s71_s2 = inlined_call_operand.vmem [shape: f32[3,16], index: 2, kind: output, shape index: {}, may-alias: {1,2}]  }
   0x1   :  { %v12_v0 = vld [vmem:[%s69_s1] sm:$0x7]  ;;  %v33_v13 = vstv %s70_s0 }
   0x2   :  { %v13_v1 = vmul.f32 %v12_v0, %v12_v0 }
   0x4   :  { %v15_v2 = vrot.slane %v13_v1, 1  ;;  %v18_v3 = vrot.slane %v13_v1, 2 }
   0x6   :  { %v17_v4 = vadd.f32 %v15_v2, %v13_v1 }
   0x8   :  { %v20_v5 = vadd.f32 %v18_v3, %v17_v4 }
   0xa   :  { %v21_v6 = vmax.f32 %v20_v5, 1e-16 }
   0xc   :  { %43 = vrsqrt.f32 %v21_v6  ;;  %vm28_vm0 = vweird.f32 %v21_v6 }
  0x12   :  { %v44_v7 = vpop.eup %43 }
  0x13   :  { %v23_v8 = vmul.f32 %v44_v7, %v21_v6  ;;  %vm29_vm1 = vweird.f32 %v44_v7 }
  0x14   :  { %vm30_vm2 = vmor %vm28_vm0, %vm29_vm1 }
  0x15   :  { %v24_v9 = vmul.f32 %v44_v7, %v23_v8 }
  0x17   :  { %v25_v10 = vmul.f32 0.5, %v24_v9 }
  0x19   :  { %v26_v11 = vsub.f32 1.5, %v25_v10 }
  0x1b   :  { %v27_v12 = vmul.f32 %v44_v7, %v26_v11 }
  0x1d   :  { %v31_v14 = vsel %vm30_vm2, %v44_v7, %v27_v12 }
  0x1e   :  { %v34_v15 = vmul.f32 %v33_v13, %v31_v14 }
  0x20   :  { %v35_v16 = vperm.slane %v34_v15, 0 }
  0x22   :  { %v36_v17 = vmul.f32 %v35_v16, %v12_v0 }
  0x24   :  { %38 = vst.msk [vmem:[%s71_s2] sm:$0x7] %vm37_vm3, %v36_v17 }

</bundles_post_ra>
